<compile_context>
chip_gen: v7x
topology: tpu7x:2x2x1
jax: 0.10.0
libtpu: 0.0.40
codegen_flags: <defaults>
</compile_context>

<pallas_src>
import jax
import jax.numpy as jnp
from jax.experimental import pallas as pl
from jax.experimental.pallas import tpu as pltpu


def _state_predictor_kernel(s_ref, a_ref,
                            w1s_ref, w1a_ref, b1_ref,
                            w2_ref, b2_ref,
                            w3_ref, b3_ref,
                            o_ref):
    # Layer 1: cat([s, a], 1) @ W1 + b1  ==  s @ W1_s + a @ W1_a + b1
    s = s_ref[...].astype(jnp.bfloat16)
    a = a_ref[...].astype(jnp.bfloat16)
    h1 = (jnp.dot(s, w1s_ref[...], preferred_element_type=jnp.float32)
          + jnp.dot(a, w1a_ref[...], preferred_element_type=jnp.float32)
          + b1_ref[...])
    h1 = jnp.tanh(h1)

    # Layer 2
    h2 = jnp.dot(h1.astype(jnp.bfloat16), w2_ref[...],
                 preferred_element_type=jnp.float32) + b2_ref[...]
    h2 = jnp.tanh(h2)

    # Layer 3 (no activation)
    out = jnp.dot(h2.astype(jnp.bfloat16), w3_ref[...],
                  preferred_element_type=jnp.float32) + b3_ref[...]
    o_ref[...] = out.astype(o_ref.dtype)


def state_predictor(states, actions, params, *, tile_b: int = 1024):
    """states: (B, S) f32, actions: (B, A) f32 -> (B, S) f32."""
    B, S = states.shape
    _, A = actions.shape
    w1s, w1a, b1, w2, b2, w3, b3 = params
    H = w1s.shape[1]

    # Batch tile: large to amortize per-step overhead; must be a multiple of 8
    # or the full batch (small-B case).
    tb = B if B <= tile_b else tile_b
    grid = (pl.cdiv(B, tb),)

    def batch_spec(cols):
        return pl.BlockSpec((tb, cols), lambda i: (i, 0))

    def const_spec(shape):
        return pl.BlockSpec(shape, lambda i: (0, 0))

    flops = 2 * B * ((S + A) * H + H * H + H * S)
    transcendentals = 2 * B * H
    bytes_accessed = (4 * B * (S + A + S)                  # f32 activations in/out
                      + 2 * ((S + A) * H + H * H + H * S)  # bf16 weights
                      + 4 * (H + H + S))                   # f32 biases

    return pl.pallas_call(
        _state_predictor_kernel,
        out_shape=jax.ShapeDtypeStruct((B, S), states.dtype),
        grid=grid,
        in_specs=[
            batch_spec(S),        # states  (tiled over batch)
            batch_spec(A),        # actions (tiled over batch)
            const_spec((S, H)),   # w1s  (resident)
            const_spec((A, H)),   # w1a  (resident)
            const_spec((1, H)),   # b1
            const_spec((H, H)),   # w2
            const_spec((1, H)),   # b2
            const_spec((H, S)),   # w3
            const_spec((1, S)),   # b3
        ],
        out_specs=batch_spec(S),
        compiler_params=pltpu.CompilerParams(
            dimension_semantics=("parallel",),
            vmem_limit_bytes=32 * 1024 * 1024,
        ),
        cost_estimate=pl.CostEstimate(
            flops=flops,
            transcendentals=transcendentals,
            bytes_accessed=bytes_accessed,
        ),
    )(states, actions, w1s, w1a, b1, w2, b2, w3, b3)


def init_params(key, state_channels, action_channels):
    """Deterministic synthetic init (PyTorch-Linear-like uniform fan-in bound)."""
    S, A = state_channels, action_channels
    H = 2 * S
    keys = jax.random.split(key, 6)

    def lin(kw, kb, fan_in, fan_out):
        bound = 1.0 / jnp.sqrt(fan_in)
        # stored as (in, out) == transpose of PyTorch (out, in); bf16 for the MXU
        w = jax.random.uniform(kw, (fan_in, fan_out), jnp.float32, -bound, bound)
        b = jax.random.uniform(kb, (1, fan_out), jnp.float32, -bound, bound)
        return w.astype(jnp.bfloat16), b

    w1, b1 = lin(keys[0], keys[1], S + A, H)
    w2, b2 = lin(keys[2], keys[3], H, H)
    w3, b3 = lin(keys[4], keys[5], H, S)

    # split W1 into the states-part and actions-part (fuses the concat)
    w1s, w1a = w1[:S, :], w1[S:, :]
    return (w1s, w1a, b1, w2, b2, w3, b3)


def reference(states, actions, params):
    """Pure-JAX f32 reference (weights upcast from their bf16 storage)."""
    w1s, w1a, b1, w2, b2, w3, b3 = params
    f32 = lambda t: t.astype(jnp.float32)
    x = jnp.concatenate([states, actions], axis=1)
    w1 = jnp.concatenate([f32(w1s), f32(w1a)], axis=0)
    h1 = jnp.tanh(x @ w1 + b1)
    h2 = jnp.tanh(h1 @ f32(w2) + b2)
    return h2 @ f32(w3) + b3


if __name__ == "__main__":
    state_channels = 32
    action_channels = 16
    batch = 48            # small demo; tile_b=16 -> grid of 3 batch tiles

    key = jax.random.PRNGKey(0)
    k_s, k_a, k_p = jax.random.split(key, 3)

    states = jax.random.normal(k_s, (batch, state_channels), jnp.float32)
    actions = jax.random.normal(k_a, (batch, action_channels), jnp.float32)
    params = init_params(k_p, state_channels, action_channels)

    out = state_predictor(states, actions, params, tile_b=16)
    out = jax.block_until_ready(out)

    ref = reference(states, actions, params)
    assert out.shape == (batch, state_channels)
    # bf16 MXU inputs with f32 accumulation -> relaxed tolerance vs f32 reference.
    assert jnp.allclose(out, ref, atol=3e-2, rtol=3e-2), \
        f"max abs diff = {jnp.max(jnp.abs(out - ref))}"

    print("KERNEL_OK")
</pallas_src>

<mosaic_0001>
module attributes {stable_mosaic.version = 11 : i64} {
  func.func @_state_predictor_kernel(%arg0: i32, %arg1: memref<16x32xf32, #tpu.memory_space<vmem>>, %arg2: memref<16x16xf32, #tpu.memory_space<vmem>>, %arg3: memref<32x64xbf16, #tpu.memory_space<vmem>>, %arg4: memref<16x64xbf16, #tpu.memory_space<vmem>>, %arg5: memref<1x64xf32, #tpu.memory_space<vmem>>, %arg6: memref<64x64xbf16, #tpu.memory_space<vmem>>, %arg7: memref<1x64xf32, #tpu.memory_space<vmem>>, %arg8: memref<64x32xbf16, #tpu.memory_space<vmem>>, %arg9: memref<1x32xf32, #tpu.memory_space<vmem>>, %arg10: memref<16x32xf32, #tpu.memory_space<vmem>>) attributes {dimension_semantics = [#tpu.dimension_semantics<parallel>], iteration_bounds = array<i64: 3>, scalar_prefetch = 0 : i64, scratch_operands = 0 : i64, tpu.core_type = #tpu.core_type<tc>, window_params = [{transform_indices = @transform_0, window_bounds = array<i64: 16, 32>}, {transform_indices = @transform_1, window_bounds = array<i64: 16, 16>}, {pipeline_mode = #tpu.pipeline_mode<synchronous>, transform_indices = @transform_2, window_bounds = array<i64: 32, 64>}, {pipeline_mode = #tpu.pipeline_mode<synchronous>, transform_indices = @transform_3, window_bounds = array<i64: 16, 64>}, {pipeline_mode = #tpu.pipeline_mode<synchronous>, transform_indices = @transform_4, window_bounds = array<i64: 1, 64>}, {pipeline_mode = #tpu.pipeline_mode<synchronous>, transform_indices = @transform_5, window_bounds = array<i64: 64, 64>}, {pipeline_mode = #tpu.pipeline_mode<synchronous>, transform_indices = @transform_6, window_bounds = array<i64: 1, 64>}, {pipeline_mode = #tpu.pipeline_mode<synchronous>, transform_indices = @transform_7, window_bounds = array<i64: 64, 32>}, {pipeline_mode = #tpu.pipeline_mode<synchronous>, transform_indices = @transform_8, window_bounds = array<i64: 1, 32>}, {transform_indices = @transform_9, window_bounds = array<i64: 16, 32>}]} {
    %c0 = arith.constant 0 : index
    %c0_0 = arith.constant 0 : index
    %0 = vector.load %arg1[%c0, %c0_0] : memref<16x32xf32, #tpu.memory_space<vmem>>, vector<16x32xf32>
    %1 = arith.truncf %0 : vector<16x32xf32> to vector<16x32xbf16>
    %c0_1 = arith.constant 0 : index
    %c0_2 = arith.constant 0 : index
    %2 = vector.load %arg2[%c0_1, %c0_2] : memref<16x16xf32, #tpu.memory_space<vmem>>, vector<16x16xf32>
    %3 = arith.truncf %2 : vector<16x16xf32> to vector<16x16xbf16>
    %c0_3 = arith.constant 0 : index
    %c0_4 = arith.constant 0 : index
    %4 = vector.load %arg3[%c0_3, %c0_4] : memref<32x64xbf16, #tpu.memory_space<vmem>>, vector<32x64xbf16>
    %cst = arith.constant dense<0.000000e+00> : vector<16x64xf32>
    %5 = tpu.matmul %1, %4, %cst {dimension_numbers = #tpu.dot_dimension_numbers<[1], [0], [0], [1], [0, 0, 1, 1], [], []>} : vector<16x32xbf16>, vector<32x64xbf16>, vector<16x64xf32> -> vector<16x64xf32>
    %c0_5 = arith.constant 0 : index
    %c0_6 = arith.constant 0 : index
    %6 = vector.load %arg4[%c0_5, %c0_6] : memref<16x64xbf16, #tpu.memory_space<vmem>>, vector<16x64xbf16>
    %cst_7 = arith.constant dense<0.000000e+00> : vector<16x64xf32>
    %7 = tpu.matmul %3, %6, %cst_7 {dimension_numbers = #tpu.dot_dimension_numbers<[1], [0], [0], [1], [0, 0, 1, 1], [], []>} : vector<16x16xbf16>, vector<16x64xbf16>, vector<16x64xf32> -> vector<16x64xf32>
    %8 = arith.addf %5, %7 : vector<16x64xf32>
    %c0_8 = arith.constant 0 : index
    %c0_9 = arith.constant 0 : index
    %9 = vector.load %arg5[%c0_8, %c0_9] : memref<1x64xf32, #tpu.memory_space<vmem>>, vector<1x64xf32>
    %10 = vector.broadcast %9 : vector<1x64xf32> to vector<16x64xf32>
    %11 = arith.addf %8, %10 : vector<16x64xf32>
    %12 = math.tanh %11 : vector<16x64xf32>
    %13 = arith.truncf %12 : vector<16x64xf32> to vector<16x64xbf16>
    %c0_10 = arith.constant 0 : index
    %c0_11 = arith.constant 0 : index
    %14 = vector.load %arg6[%c0_10, %c0_11] : memref<64x64xbf16, #tpu.memory_space<vmem>>, vector<64x64xbf16>
    %cst_12 = arith.constant dense<0.000000e+00> : vector<16x64xf32>
    %15 = tpu.matmul %13, %14, %cst_12 {dimension_numbers = #tpu.dot_dimension_numbers<[1], [0], [0], [1], [0, 0, 1, 1], [], []>} : vector<16x64xbf16>, vector<64x64xbf16>, vector<16x64xf32> -> vector<16x64xf32>
    %c0_13 = arith.constant 0 : index
    %c0_14 = arith.constant 0 : index
    %16 = vector.load %arg7[%c0_13, %c0_14] : memref<1x64xf32, #tpu.memory_space<vmem>>, vector<1x64xf32>
    %17 = vector.broadcast %16 : vector<1x64xf32> to vector<16x64xf32>
    %18 = arith.addf %15, %17 : vector<16x64xf32>
    %19 = math.tanh %18 : vector<16x64xf32>
    %20 = arith.truncf %19 : vector<16x64xf32> to vector<16x64xbf16>
    %c0_15 = arith.constant 0 : index
    %c0_16 = arith.constant 0 : index
    %21 = vector.load %arg8[%c0_15, %c0_16] : memref<64x32xbf16, #tpu.memory_space<vmem>>, vector<64x32xbf16>
    %cst_17 = arith.constant dense<0.000000e+00> : vector<16x32xf32>
    %22 = tpu.matmul %20, %21, %cst_17 {dimension_numbers = #tpu.dot_dimension_numbers<[1], [0], [0], [1], [0, 0, 1, 1], [], []>} : vector<16x64xbf16>, vector<64x32xbf16>, vector<16x32xf32> -> vector<16x32xf32>
    %c0_18 = arith.constant 0 : index
    %c0_19 = arith.constant 0 : index
    %23 = vector.load %arg9[%c0_18, %c0_19] : memref<1x32xf32, #tpu.memory_space<vmem>>, vector<1x32xf32>
    %24 = vector.broadcast %23 : vector<1x32xf32> to vector<16x32xf32>
    %25 = arith.addf %22, %24 : vector<16x32xf32>
    %c0_20 = arith.constant 0 : index
    %c0_21 = arith.constant 0 : index
    %26 = vector.load %arg10[%c0_20, %c0_21] : memref<16x32xf32, #tpu.memory_space<vmem>>, vector<16x32xf32>
    tpu.vector_store %arg10[%c0_20, %c0_21], %25 {strides = array<i32>} : memref<16x32xf32, #tpu.memory_space<vmem>>, vector<16x32xf32>,
    return
  }
  func.func @transform_0(%arg0: i32) -> (i32, i32) {
    %c0_i32 = arith.constant 0 : i32
    %c0_i32_0 = arith.constant 0 : i32
    return %arg0, %c0_i32 : i32, i32
  }
  func.func @transform_1(%arg0: i32) -> (i32, i32) {
    %c0_i32 = arith.constant 0 : i32
    %c0_i32_0 = arith.constant 0 : i32
    return %arg0, %c0_i32 : i32, i32
  }
  func.func @transform_2(%arg0: i32) -> (i32, i32) {
    %c0_i32 = arith.constant 0 : i32
    %c0_i32_0 = arith.constant 0 : i32
    %c0_i32_1 = arith.constant 0 : i32
    return %c0_i32, %c0_i32_0 : i32, i32
  }
  func.func @transform_3(%arg0: i32) -> (i32, i32) {
    %c0_i32 = arith.constant 0 : i32
    %c0_i32_0 = arith.constant 0 : i32
    %c0_i32_1 = arith.constant 0 : i32
    return %c0_i32, %c0_i32_0 : i32, i32
  }
  func.func @transform_4(%arg0: i32) -> (i32, i32) {
    %c0_i32 = arith.constant 0 : i32
    %c0_i32_0 = arith.constant 0 : i32
    %c0_i32_1 = arith.constant 0 : i32
    return %c0_i32, %c0_i32_0 : i32, i32
  }
  func.func @transform_5(%arg0: i32) -> (i32, i32) {
    %c0_i32 = arith.constant 0 : i32
    %c0_i32_0 = arith.constant 0 : i32
    %c0_i32_1 = arith.constant 0 : i32
    return %c0_i32, %c0_i32_0 : i32, i32
  }
  func.func @transform_6(%arg0: i32) -> (i32, i32) {
    %c0_i32 = arith.constant 0 : i32
    %c0_i32_0 = arith.constant 0 : i32
    %c0_i32_1 = arith.constant 0 : i32
    return %c0_i32, %c0_i32_0 : i32, i32
  }
  func.func @transform_7(%arg0: i32) -> (i32, i32) {
    %c0_i32 = arith.constant 0 : i32
    %c0_i32_0 = arith.constant 0 : i32
    %c0_i32_1 = arith.constant 0 : i32
    return %c0_i32, %c0_i32_0 : i32, i32
  }
  func.func @transform_8(%arg0: i32) -> (i32, i32) {
    %c0_i32 = arith.constant 0 : i32
    %c0_i32_0 = arith.constant 0 : i32
    %c0_i32_1 = arith.constant 0 : i32
    return %c0_i32, %c0_i32_0 : i32, i32
  }
  func.func @transform_9(%arg0: i32) -> (i32, i32) {
    %c0_i32 = arith.constant 0 : i32
    %c0_i32_0 = arith.constant 0 : i32
    return %arg0, %c0_i32 : i32, i32
  }
}

</mosaic_0001>

<bundles_post_ra>
// kernel: tpu_custom_call.1
= control target key start
LH: loop header
LB: loop body
LE: loop exit
PB: predicated region body
PF: predicated region fallthrough
CT: control target
= control target key end

     0   :  { %s904_s30 = smov 0   ;;  %s995_s0 = inlined_call_operand.vmem [shape: f32[48,32], index: 0, kind: input, shape index: {}]   ;;  %s996_s1 = inlined_call_operand.vmem [shape: f32[48,16], index: 1, kind: input, shape index: {}]   ;;  %s997_s2 = inlined_call_operand.vmem [shape: bf16[32,64], index: 2, kind: input, shape index: {}]   ;;  %s998_s3 = inlined_call_operand.vmem [shape: bf16[16,64], index: 3, kind: input, shape index: {}]   ;;  %s999_s4 = inlined_call_operand.vmem [shape: f32[1,64], index: 4, kind: input, shape index: {}]   ;;  %s1000_s5 = inlined_call_operand.vmem [shape: bf16[64,64], index: 5, kind: input, shape index: {}]   ;;  %s1001_s6 = inlined_call_operand.vmem [shape: f32[1,64], index: 6, kind: input, shape index: {}]   ;;  %s1002_s7 = inlined_call_operand.vmem [shape: bf16[64,32], index: 7, kind: input, shape index: {}]   ;;  %s1003_s8 = inlined_call_operand.vmem [shape: f32[1,32], index: 8, kind: input, shape index: {}]   ;;  %s1004_s9 = inlined_call_operand.vmem [shape: f32[48,32], index: 9, kind: output, shape index: {}]  }
   0x1 LB: > { %s731_s10 = sadd.s32 4294967295, %s850_s30   ;;  %p735_p0 = scmp.ge.s32.totalorder %s850_s30, 1  ;;  %s850_s30 = sphi %s904_s30, %s19_s30  }
   0x2   : > { %p299_p1 = scmp.lt.s32.totalorder %s850_s30, 4 }
   0x4   : > { %p300_p2 = pnand %p735_p0, %p299_p1 }
   0x5   : > { %v825_v0 = vld [vmem:[%s997_s2] sm:$0xff] (!%p300_p2)   ;;  %v852_v1 = vmov (!%p300_p2), 0.0   ;;  %v827_v3 = vld [vmem:[%s997_s2 + $0x8] sm:$0xff] (!%p300_p2)   ;;  %vm853_vm0 = vmmov (!%p300_p2), 0   ;;  %s736_s17 = sshll.u32 (!%p300_p2), %s731_s10, 1  ;;  %vm377_vm1 = vcmask (!%p300_p2), 130048  }
   0x6   : > { %303 = sbr.rel (%p300_p2) target bundleno = 697 (0x2b9), region = 56  ;;  %783 = vmatprep.subr.bf16.mxu1 (!%p300_p2), %v852_v1  ;;  %777 = vmatprep.subr.bf16.mxu0 (!%p300_p2), %v852_v1  ;;  %v826_v2 = vld [vmem:[%s998_s3] sm:$0xff] (!%p300_p2)   ;;  %p341_p3 = scmp.lt.s32.totalorder (!%p300_p2), %s736_s17, 5  ;;  %vm434_vm2 = vcmask (!%p300_p2), 261120   ;;  %v829_v11 = vld [vmem:[%s1000_s5 + $0x8] sm:$0xff] (!%p300_p2)   ;;  %v830_v12 = vld [vmem:[%s1000_s5 + $0x10] sm:$0xff] (!%p300_p2)  }
   0x7   : > { %784 = vmatpush3.bf16.msra.mxu1 (!%p300_p2), %v825_v0  ;;  %779 = vmatprep.mubr.msk.bf16.mxu0 (!%p300_p2), %vm853_vm0, %v852_v1  ;;  %v828_v10 = vld [vmem:[%s1000_s5] sm:$0xff] (!%p300_p2)   ;;  %v831_v13 = vld [vmem:[%s1000_s5 + $0x18] sm:$0xff] (!%p300_p2)   ;;  %vm530_vm3 = vcmask (!%p300_p2), 523264   ;;  %v833_v31 = vld [vmem:[%s1002_s7 + $0x8] sm:$0xff] (!%p300_p2)  }
   0x8   : > { %785 = vmatprep.subr.bf16.mxu1 (!%p300_p2), %v852_v1  ;;  %778 = vmatpush3.bf16.msra.mxu0 (!%p300_p2), %v826_v2  ;;  %v747_v16 = vld [vmem:[%s999_s4] ss:$0 sm:$0xff] (!%p300_p2)  ;;  %v834_v32 = vld [vmem:[%s1002_s7 + $0x10] sm:$0xff] (!%p300_p2)   ;;  %v835_v33 = vld [vmem:[%s1002_s7 + $0x18] sm:$0xff] (!%p300_p2)  }
   0x9   : > { %787 = vmatprep.mubr.msk.bf16.mxu1 (!%p300_p2), %vm853_vm0, %v852_v1  ;;  %791 = vmatprep.subr.bf16.mxu0 (!%p300_p2), %v852_v1  ;;  %v832_v30 = vld [vmem:[%s1002_s7] sm:$0xff] (!%p300_p2)  }
   0xa   : > { %v748_v34 = vld [vmem:[%s1001_s6] ss:$0 sm:$0xff] (!%p300_p2) }
   0xb   : > { %786 = vmatpush3.bf16.msra.mxu1 (!%p300_p2), %v827_v3  ;;  %v754_v44 = vld [vmem:[%s1003_s8] ss:$0 sm:$0xff] (!%p300_p2) }
   0xc   : > { %803 = vmatprep.subr.bf16.mxu1 (!%p300_p2), %v852_v1 }
   0xd   : > { %s1006_s17 = smov (!%p341_p3, %s736_s17), 5 }
   0xe   : > { %s929_s18 = sshll.u32 %s1006_s17, 3 }
   0xf   : > { %s350_s21 = scalar_lea.vmem %s996_s1, %s929_s18  ;;  %s344_s24 = scalar_lea.vmem %s995_s0, %s929_s18 }
  0x10   : > { %v362_v4 = vld [vmem:[%s350_s21] sm:$0xff]  ;;  %v363_v5 = vld [vmem:[%s350_s21 + $0x8] sm:$0xff]  ;;  %s356_s10 = scalar_lea.vmem %s1004_s9, %s929_s18 }
  0x11   : > { %v359_v6 = vld [vmem:[%s344_s24] sm:$0xff]  ;;  %v364_v7 = vpack.c.bf16 %v363_v5, %v362_v4  ;;  %v360_v8 = vld [vmem:[%s344_s24 + $0x8] sm:$0xff] }
  0x12   : > { %v361_v9 = vpack.c.bf16 %v360_v8, %v359_v6 }
  0x13   : > { %780 = vmatmul.mubr.msk.bf16.vlgmr.msra.gmra.mrb[0].mxu0 %vm377_vm1, %v364_v7 }
  0x14   : > { %788 = vmatmul.mubr.msk.bf16.vlgmr.msra.gmra.mrb[0].mxu1 %vm434_vm2, %v361_v9  ;;  %799 = vmatprep.mubr.msk.bf16.mxu0 %vm853_vm0, %v852_v1 }
  0x15   : > { %811 = vmatprep.mubr.msk.bf16.mxu1 %vm853_vm0, %v852_v1  ;;  %792 = vmatpush3.bf16.msra.mxu0 %v828_v10 }
  0x16   : > { %793 = vmatprep.subr.bf16.mxu0 %v852_v1  ;;  %804 = vmatpush3.bf16.msra.mxu1 %v832_v30 }
  0x17   : > { %805 = vmatprep.subr.bf16.mxu1 %v852_v1 }
  0x19   : > { %794 = vmatpush3.bf16.msra.mxu0 %v829_v11 }
  0x1a   : > { %795 = vmatprep.subr.bf16.mxu0 %v852_v1  ;;  %806 = vmatpush3.bf16.msra.mxu1 %v833_v31 }
  0x1b   : > { %807 = vmatprep.subr.bf16.mxu1 %v852_v1 }
  0x1d   : > { %796 = vmatpush3.bf16.msra.mxu0 %v830_v12 }
  0x1e   : > { %797 = vmatprep.subr.bf16.mxu0 %v852_v1  ;;  %808 = vmatpush3.bf16.msra.mxu1 %v834_v32 }
  0x1f   : > { %809 = vmatprep.subr.bf16.mxu1 %v852_v1 }
  0x21   : > { %798 = vmatpush3.bf16.msra.mxu0 %v831_v13 }
  0x22   : > { %810 = vmatpush3.bf16.msra.mxu1 %v835_v33 }
  0xe6   : > { %v415_v14 = vpop.f32.mrb[0].mxu0 }
  0xe7   : > { %v472_v15 = vpop.f32.mrb[0].mxu1  ;;  %v781_v17 = vpop.f32.mrb[1].mxu0 }
  0xe8   : > { %v473_v18 = vadd.f32 %v472_v15, %v415_v14  ;;  %v789_v19 = vpop.f32.mrb[1].mxu1  ;;  %v418_v20 = vpop.f32.mrb[2].mxu0 }
  0xe9   : > { %v475_v21 = vpop.f32.mrb[2].mxu1  ;;  %v782_v22 = vpop.f32.mrb[3].mxu0 }
  0xea   : > { %v486_v23 = vadd.f32 %v747_v16, %v473_v18  ;;  %v476_v24 = vadd.f32 %v475_v21, %v418_v20  ;;  %v790_v25 = vpop.f32.mrb[3].mxu1 }
  0xec   : > { %v487_v26 = vadd.f32 %v747_v16, %v476_v24  ;;  %836 = vtanh.f32 %v486_v23 }
  0xee   : > { %838 = vtanh.f32 %v487_v26 }
  0xf6   : > { %v837_v27 = vpop.eup %836 }
  0xf8   : > { %v839_v28 = vpop.eup %838 }
  0xf9   : > { %v490_v29 = vpack.c.bf16 %v839_v28, %v837_v27 }
  0xfb   : > { %800 = vmatmul.mubr.msk.bf16.vlgmr.msra.gmra.mrb[4].mxu0 %vm530_vm3, %v490_v29 }
 0x1ce   : > { %v568_v35 = vpop.f32.mrb[4].mxu0 }
 0x1cf   : > { %v569_v36 = vadd.f32 %v748_v34, %v568_v35  ;;  %v801_v37 = vpop.f32.mrb[5].mxu0 }
 0x1d0   : > { %v571_v38 = vpop.f32.mrb[6].mxu0 }
 0x1d1   : > { %v572_v39 = vadd.f32 %v748_v34, %v571_v38  ;;  %v802_v40 = vpop.f32.mrb[7].mxu0  ;;  %840 = vtanh.f32 %v569_v36 }
 0x1d3   : > { %842 = vtanh.f32 %v572_v39 }
 0x1db   : > { %v841_v41 = vpop.eup %840 }
 0x1dd   : > { %v843_v42 = vpop.eup %842 }
 0x1de   : > { %v577_v43 = vpack.c.bf16 %v843_v42, %v841_v41 }
 0x1e0   : > { %812 = vmatmul.mubr.msk.bf16.vlgmr.msra.gmra.mrb[4].mxu1 %vm530_vm3, %v577_v43 }
 0x2b3   : > { %v654_v45 = vpop.f32.mrb[4].mxu1 }
 0x2b4   : > { %v655_v46 = vadd.f32 %v754_v44, %v654_v45  ;;  %v813_v47 = vpop.f32.mrb[5].mxu1 }
 0x2b5   : > { %v657_v48 = vpop.f32.mrb[6].mxu1 }
 0x2b6   : > { %661 = vst.msk [vmem:[%s356_s10] sm:$0xff] %vm434_vm2, %v655_v46  ;;  %v658_v49 = vadd.f32 %v754_v44, %v657_v48  ;;  %v814_v50 = vpop.f32.mrb[7].mxu1 }
 0x2b8   : > { %662 = vst.msk [vmem:[%s356_s10 + $0x8] sm:$0xff] %vm434_vm2, %v658_v49 }
 0x2b9 PF: > { %s19_s30 = sadd.s32 1, %s850_s30  }
 0x2ba   : > { %p16_p4 = scmp.ge.s32.totalorder %s19_s30, 5  }
 0x2bc   :  { %18 = sbr.rel (!%p16_p4) target bundleno = 1 (0x1), region = 89 }

</bundles_post_ra>
